<compile_context>
chip_gen: v6e
topology: v6e:2x2x1
jax: 0.10.0
libtpu: 0.0.40
codegen_flags: <defaults>
</compile_context>

<pallas_src>
import jax
import jax.numpy as jnp
from jax.experimental import pallas as pl
from jax.experimental.pallas import tpu as pltpu

KH = KW = 3  # 3x3 kernel, padding=1 -> 'SAME'


def _conv3x3_relu(frame_ref, w_ref, b_row, n_rows):
    """3x3 'SAME' conv + bias + ReLU on a lane-folded, row-padded frame.

    frame_ref : (n_rows + 2, W * Cin) VMEM frame, rows 0 and n_rows+1 are zero
                (height padding); width padding is baked into w_ref.
    w_ref     : (3, W * Cin, W * Cout) block-Toeplitz weights (one per ky).
    b_row     : (1, W * Cout) lane-folded bias.
    returns   : (n_rows, W * Cout) f32.
    """
    acc = jnp.dot(frame_ref[0:n_rows, :], w_ref[0],
                  preferred_element_type=jnp.float32)
    acc = acc + jnp.dot(frame_ref[1:n_rows + 1, :], w_ref[1],
                        preferred_element_type=jnp.float32)
    acc = acc + jnp.dot(frame_ref[2:n_rows + 2, :], w_ref[2],
                        preferred_element_type=jnp.float32)
    return jnp.maximum(acc + b_row, 0.0)


def _double_conv_kernel(x_ref, w1_ref, b1_ref, w2_ref, b2_ref, o_ref,
                        xpad_ref, mid_ref):
    # x_ref   : (1, H, W*Cin)   lane-folded NHWC input (unpadded)
    # w*_ref  : (3, W*C_in_or_out, W*Cout)  block-Toeplitz conv weights
    # b*_ref  : (1, W*Cout)
    # o_ref   : (1, H, W*Cout)  lane-dense output
    # xpad_ref: (H+2, W*Cin)    VMEM frame ('SAME' height padding for conv1)
    # mid_ref : (H+2, W*Cout)   VMEM frame for conv1 activations
    H = x_ref.shape[1]

    zrow_in = jnp.zeros((1, xpad_ref.shape[1]), jnp.float32)
    xpad_ref[0:1, :] = zrow_in                       # top zero row
    xpad_ref[H + 1:H + 2, :] = zrow_in               # bottom zero row
    xpad_ref[1:H + 1, :] = x_ref[0].astype(jnp.float32)

    act1 = _conv3x3_relu(xpad_ref, w1_ref, b1_ref[...], H)   # (H, W*Cout)

    zrow_mid = jnp.zeros((1, mid_ref.shape[1]), jnp.float32)
    mid_ref[0:1, :] = zrow_mid
    mid_ref[H + 1:H + 2, :] = zrow_mid
    mid_ref[1:H + 1, :] = act1

    act2 = _conv3x3_relu(mid_ref, w2_ref, b2_ref[...], H)    # (H, W*Cout)
    o_ref[0] = act2.astype(o_ref.dtype)


def _band_weights(w_hwio, width):
    """(3,3,Cin,Cout) HWIO -> (3, width*Cin, width*Cout) block-Toeplitz.

    mat[ky][w_in*Cin + ci, w_out*Cout + co] = w[ky, w_in - w_out + 1, ci, co]
    (zero outside the 3-tap band / image bounds), so width 'SAME' padding is
    absorbed into the weights: a 3x3 conv over a height-zero-padded,
    lane-folded row block is `rows @ mat[ky]` summed over the 3 row shifts.
    """
    kh, kw, cin, cout = w_hwio.shape
    w_in = jnp.arange(width)
    w_out = jnp.arange(width)
    kx = jnp.arange(kw)
    # input pixel feeding output w_out at horizontal tap kx is w_out + kx - 1
    place = (w_in[None, :, None] == w_out[None, None, :] + kx[:, None, None] - 1)
    place = place.astype(w_hwio.dtype)                        # (kw, W, W)
    t = jnp.einsum("kpq,ykio->ypiqo", place, w_hwio)          # (kh, W, Cin, W, Cout)
    return t.reshape(kh, width * cin, width * cout)


def double_convolution(x_nchw, w1, b1, w2, b2):
    """x_nchw: (N, Cin, H, W); w*: HWIO (3,3,ci,co); b*: (co,). Returns NCHW."""
    N, Cin, H, W = x_nchw.shape
    Cout = w1.shape[-1]

    # lane-fold: (N, H, W*Cin), channels fastest on the lane axis
    x_fold = jnp.transpose(x_nchw, (0, 2, 3, 1)).reshape(N, H, W * Cin)
    w1m = _band_weights(w1.astype(jnp.float32), W)            # (3, 64, 128)
    w2m = _band_weights(w2.astype(jnp.float32), W)            # (3, 128, 128)
    b1r = jnp.tile(b1.astype(jnp.float32), W).reshape(1, W * Cout)
    b2r = jnp.tile(b2.astype(jnp.float32), W).reshape(1, W * Cout)

    out = pl.pallas_call(
        _double_conv_kernel,
        out_shape=jax.ShapeDtypeStruct((N, H, W * Cout), x_nchw.dtype),
        grid_spec=pltpu.PrefetchScalarGridSpec(
            num_scalar_prefetch=0,
            grid=(N,),  # one image per grid step; steps fully independent
            in_specs=[
                pl.BlockSpec((1, H, W * Cin), lambda b: (b, 0, 0)),
                pl.BlockSpec((KH, W * Cin, W * Cout), lambda b: (0, 0, 0)),
                pl.BlockSpec((1, W * Cout), lambda b: (0, 0)),
                pl.BlockSpec((KH, W * Cout, W * Cout), lambda b: (0, 0, 0)),
                pl.BlockSpec((1, W * Cout), lambda b: (0, 0)),
            ],
            out_specs=pl.BlockSpec((1, H, W * Cout), lambda b: (b, 0, 0)),
            scratch_shapes=[
                pltpu.VMEM((H + 2, W * Cin), jnp.float32),
                pltpu.VMEM((H + 2, W * Cout), jnp.float32),
            ],
        ),
        compiler_params=pltpu.CompilerParams(
            dimension_semantics=("parallel",),
            vmem_limit_bytes=32 * 1024 * 1024,
        ),
    )(x_fold, w1m, b1r, w2m, b2r)

    # (N, H, W*Cout) -> (N, Cout, H, W)
    return jnp.transpose(out.reshape(N, H, W, Cout), (0, 3, 1, 2))


if __name__ == "__main__":
    N, Cin, Cout, H, W = 2, 4, 8, 16, 16

    key = jax.random.PRNGKey(0)
    k_x, k_w1, k_b1, k_w2, k_b2 = jax.random.split(key, 5)

    x = jax.random.normal(k_x, (N, Cin, H, W), jnp.float32)

    # Deterministic parameter init (PyTorch-style uniform(-1/sqrt(fan_in), .))
    lim1 = float(1.0 / (Cin * KH * KW) ** 0.5)
    w1 = jax.random.uniform(k_w1, (KH, KW, Cin, Cout), jnp.float32, -lim1, lim1)
    b1 = jax.random.uniform(k_b1, (Cout,), jnp.float32, -lim1, lim1)
    lim2 = float(1.0 / (Cout * KH * KW) ** 0.5)
    w2 = jax.random.uniform(k_w2, (KH, KW, Cout, Cout), jnp.float32, -lim2, lim2)
    b2 = jax.random.uniform(k_b2, (Cout,), jnp.float32, -lim2, lim2)

    # Pure-JAX reference (same math as nn.Conv2d(pad=1) + ReLU, twice)
    dn = ("NHWC", "HWIO", "NHWC")
    x_nhwc = jnp.transpose(x, (0, 2, 3, 1))
    y1 = jax.lax.conv_general_dilated(x_nhwc, w1, (1, 1), "SAME",
                                      dimension_numbers=dn) + b1
    y1 = jnp.maximum(y1, 0.0)
    y2 = jax.lax.conv_general_dilated(y1, w2, (1, 1), "SAME",
                                      dimension_numbers=dn) + b2
    y2 = jnp.maximum(y2, 0.0)
    ref = jnp.transpose(y2, (0, 3, 1, 2))

    out = jax.block_until_ready(double_convolution(x, w1, b1, w2, b2))

    assert out.shape == (N, Cout, H, W), out.shape
    err = float(jnp.max(jnp.abs(out - ref)))
    assert jnp.allclose(out, ref, atol=2e-4, rtol=2e-4), err
    print("KERNEL_OK")
</pallas_src>

<mosaic_0001>
module attributes {stable_mosaic.version = 11 : i64} {
  func.func @_double_conv_kernel(%arg0: i32, %arg1: memref<1x16x64xf32, #tpu.memory_space<vmem>>, %arg2: memref<3x64x128xf32, #tpu.memory_space<vmem>>, %arg3: memref<1x128xf32, #tpu.memory_space<vmem>>, %arg4: memref<3x128x128xf32, #tpu.memory_space<vmem>>, %arg5: memref<1x128xf32, #tpu.memory_space<vmem>>, %arg6: memref<1x16x128xf32, #tpu.memory_space<vmem>>, %arg7: memref<18x64xf32, #tpu.memory_space<vmem>>, %arg8: memref<18x128xf32, #tpu.memory_space<vmem>>) attributes {dimension_semantics = [#tpu.dimension_semantics<parallel>], iteration_bounds = array<i64: 2>, scalar_prefetch = 0 : i64, scratch_operands = 2 : i64, tpu.core_type = #tpu.core_type<tc>, window_params = [{transform_indices = @transform_0, window_bounds = array<i64: 1, 16, 64>}, {pipeline_mode = #tpu.pipeline_mode<synchronous>, transform_indices = @transform_1, window_bounds = array<i64: 3, 64, 128>}, {pipeline_mode = #tpu.pipeline_mode<synchronous>, transform_indices = @transform_2, window_bounds = array<i64: 1, 128>}, {pipeline_mode = #tpu.pipeline_mode<synchronous>, transform_indices = @transform_3, window_bounds = array<i64: 3, 128, 128>}, {pipeline_mode = #tpu.pipeline_mode<synchronous>, transform_indices = @transform_4, window_bounds = array<i64: 1, 128>}, {transform_indices = @transform_5, window_bounds = array<i64: 1, 16, 128>}]} {
    %cst = arith.constant 0.000000e+00 : f32
    %0 = vector.broadcast %cst : f32 to vector<1x64xf32>
    %c0 = arith.constant 0 : index
    %c0_0 = arith.constant 0 : index
    %1 = vector.load %arg7[%c0, %c0_0] : memref<18x64xf32, #tpu.memory_space<vmem>>, vector<1x64xf32>
    tpu.vector_store %arg7[%c0, %c0_0], %0 {strides = array<i32>} : memref<18x64xf32, #tpu.memory_space<vmem>>, vector<1x64xf32>,
    %c17 = arith.constant 17 : index
    %c0_1 = arith.constant 0 : index
    %2 = vector.load %arg7[%c17, %c0_1] : memref<18x64xf32, #tpu.memory_space<vmem>>, vector<1x64xf32>
    tpu.vector_store %arg7[%c17, %c0_1], %0 {strides = array<i32>} : memref<18x64xf32, #tpu.memory_space<vmem>>, vector<1x64xf32>,
    %c0_2 = arith.constant 0 : index
    %c0_3 = arith.constant 0 : index
    %c0_4 = arith.constant 0 : index
    %3 = vector.load %arg1[%c0_2, %c0_3, %c0_4] : memref<1x16x64xf32, #tpu.memory_space<vmem>>, vector<1x16x64xf32>
    %4 = vector.shape_cast %3 : vector<1x16x64xf32> to vector<16x64xf32>
    %c1 = arith.constant 1 : index
    %c0_5 = arith.constant 0 : index
    %5 = vector.load %arg7[%c1, %c0_5] : memref<18x64xf32, #tpu.memory_space<vmem>>, vector<16x64xf32>
    tpu.vector_store %arg7[%c1, %c0_5], %4 {strides = array<i32>} : memref<18x64xf32, #tpu.memory_space<vmem>>, vector<16x64xf32>,
    %c0_6 = arith.constant 0 : index
    %c0_7 = arith.constant 0 : index
    %6 = vector.load %arg3[%c0_6, %c0_7] : memref<1x128xf32, #tpu.memory_space<vmem>>, vector<1x128xf32>
    %c0_8 = arith.constant 0 : index
    %c0_9 = arith.constant 0 : index
    %7 = vector.load %arg7[%c0_8, %c0_9] : memref<18x64xf32, #tpu.memory_space<vmem>>, vector<16x64xf32>
    %c0_10 = arith.constant 0 : index
    %c0_11 = arith.constant 0 : index
    %c0_12 = arith.constant 0 : index
    %8 = vector.load %arg2[%c0_10, %c0_11, %c0_12] : memref<3x64x128xf32, #tpu.memory_space<vmem>>, vector<1x64x128xf32>
    %9 = vector.shape_cast %8 : vector<1x64x128xf32> to vector<64x128xf32>
    %cst_13 = arith.constant dense<0.000000e+00> : vector<16x128xf32>
    %10 = tpu.matmul %7, %9, %cst_13 {dimension_numbers = #tpu.dot_dimension_numbers<[1], [0], [0], [1], [0, 0, 1, 1], [], []>} : vector<16x64xf32>, vector<64x128xf32>, vector<16x128xf32> -> vector<16x128xf32>
    %c1_14 = arith.constant 1 : index
    %c0_15 = arith.constant 0 : index
    %11 = vector.load %arg7[%c1_14, %c0_15] : memref<18x64xf32, #tpu.memory_space<vmem>>, vector<16x64xf32>
    %c1_16 = arith.constant 1 : index
    %c0_17 = arith.constant 0 : index
    %c0_18 = arith.constant 0 : index
    %12 = vector.load %arg2[%c1_16, %c0_17, %c0_18] : memref<3x64x128xf32, #tpu.memory_space<vmem>>, vector<1x64x128xf32>
    %13 = vector.shape_cast %12 : vector<1x64x128xf32> to vector<64x128xf32>
    %cst_19 = arith.constant dense<0.000000e+00> : vector<16x128xf32>
    %14 = tpu.matmul %11, %13, %cst_19 {dimension_numbers = #tpu.dot_dimension_numbers<[1], [0], [0], [1], [0, 0, 1, 1], [], []>} : vector<16x64xf32>, vector<64x128xf32>, vector<16x128xf32> -> vector<16x128xf32>
    %15 = arith.addf %10, %14 : vector<16x128xf32>
    %c2 = arith.constant 2 : index
    %c0_20 = arith.constant 0 : index
    %16 = vector.load %arg7[%c2, %c0_20] : memref<18x64xf32, #tpu.memory_space<vmem>>, vector<16x64xf32>
    %c2_21 = arith.constant 2 : index
    %c0_22 = arith.constant 0 : index
    %c0_23 = arith.constant 0 : index
    %17 = vector.load %arg2[%c2_21, %c0_22, %c0_23] : memref<3x64x128xf32, #tpu.memory_space<vmem>>, vector<1x64x128xf32>
    %18 = vector.shape_cast %17 : vector<1x64x128xf32> to vector<64x128xf32>
    %cst_24 = arith.constant dense<0.000000e+00> : vector<16x128xf32>
    %19 = tpu.matmul %16, %18, %cst_24 {dimension_numbers = #tpu.dot_dimension_numbers<[1], [0], [0], [1], [0, 0, 1, 1], [], []>} : vector<16x64xf32>, vector<64x128xf32>, vector<16x128xf32> -> vector<16x128xf32>
    %20 = arith.addf %15, %19 : vector<16x128xf32>
    %21 = vector.broadcast %6 : vector<1x128xf32> to vector<16x128xf32>
    %22 = arith.addf %20, %21 : vector<16x128xf32>
    %cst_25 = arith.constant 0.000000e+00 : f32
    %23 = vector.broadcast %cst_25 : f32 to vector<16x128xf32>
    %24 = arith.maximumf %22, %23 : vector<16x128xf32>
    %cst_26 = arith.constant 0.000000e+00 : f32
    %25 = vector.broadcast %cst_26 : f32 to vector<1x128xf32>
    %c0_27 = arith.constant 0 : index
    %c0_28 = arith.constant 0 : index
    %26 = vector.load %arg8[%c0_27, %c0_28] : memref<18x128xf32, #tpu.memory_space<vmem>>, vector<1x128xf32>
    tpu.vector_store %arg8[%c0_27, %c0_28], %25 {strides = array<i32>} : memref<18x128xf32, #tpu.memory_space<vmem>>, vector<1x128xf32>,
    %c17_29 = arith.constant 17 : index
    %c0_30 = arith.constant 0 : index
    %27 = vector.load %arg8[%c17_29, %c0_30] : memref<18x128xf32, #tpu.memory_space<vmem>>, vector<1x128xf32>
    tpu.vector_store %arg8[%c17_29, %c0_30], %25 {strides = array<i32>} : memref<18x128xf32, #tpu.memory_space<vmem>>, vector<1x128xf32>,
    %c1_31 = arith.constant 1 : index
    %c0_32 = arith.constant 0 : index
    %28 = vector.load %arg8[%c1_31, %c0_32] : memref<18x128xf32, #tpu.memory_space<vmem>>, vector<16x128xf32>
    tpu.vector_store %arg8[%c1_31, %c0_32], %24 {strides = array<i32>} : memref<18x128xf32, #tpu.memory_space<vmem>>, vector<16x128xf32>,
    %c0_33 = arith.constant 0 : index
    %c0_34 = arith.constant 0 : index
    %29 = vector.load %arg5[%c0_33, %c0_34] : memref<1x128xf32, #tpu.memory_space<vmem>>, vector<1x128xf32>
    %c0_35 = arith.constant 0 : index
    %c0_36 = arith.constant 0 : index
    %30 = vector.load %arg8[%c0_35, %c0_36] : memref<18x128xf32, #tpu.memory_space<vmem>>, vector<16x128xf32>
    %c0_37 = arith.constant 0 : index
    %c0_38 = arith.constant 0 : index
    %c0_39 = arith.constant 0 : index
    %31 = vector.load %arg4[%c0_37, %c0_38, %c0_39] : memref<3x128x128xf32, #tpu.memory_space<vmem>>, vector<1x128x128xf32>
    %32 = vector.shape_cast %31 : vector<1x128x128xf32> to vector<128x128xf32>
    %cst_40 = arith.constant dense<0.000000e+00> : vector<16x128xf32>
    %33 = tpu.matmul %30, %32, %cst_40 {dimension_numbers = #tpu.dot_dimension_numbers<[1], [0], [0], [1], [0, 0, 1, 1], [], []>} : vector<16x128xf32>, vector<128x128xf32>, vector<16x128xf32> -> vector<16x128xf32>
    %c1_41 = arith.constant 1 : index
    %c0_42 = arith.constant 0 : index
    %34 = vector.load %arg8[%c1_41, %c0_42] : memref<18x128xf32, #tpu.memory_space<vmem>>, vector<16x128xf32>
    %c1_43 = arith.constant 1 : index
    %c0_44 = arith.constant 0 : index
    %c0_45 = arith.constant 0 : index
    %35 = vector.load %arg4[%c1_43, %c0_44, %c0_45] : memref<3x128x128xf32, #tpu.memory_space<vmem>>, vector<1x128x128xf32>
    %36 = vector.shape_cast %35 : vector<1x128x128xf32> to vector<128x128xf32>
    %cst_46 = arith.constant dense<0.000000e+00> : vector<16x128xf32>
    %37 = tpu.matmul %34, %36, %cst_46 {dimension_numbers = #tpu.dot_dimension_numbers<[1], [0], [0], [1], [0, 0, 1, 1], [], []>} : vector<16x128xf32>, vector<128x128xf32>, vector<16x128xf32> -> vector<16x128xf32>
    %38 = arith.addf %33, %37 : vector<16x128xf32>
    %c2_47 = arith.constant 2 : index
    %c0_48 = arith.constant 0 : index
    %39 = vector.load %arg8[%c2_47, %c0_48] : memref<18x128xf32, #tpu.memory_space<vmem>>, vector<16x128xf32>
    %c2_49 = arith.constant 2 : index
    %c0_50 = arith.constant 0 : index
    %c0_51 = arith.constant 0 : index
    %40 = vector.load %arg4[%c2_49, %c0_50, %c0_51] : memref<3x128x128xf32, #tpu.memory_space<vmem>>, vector<1x128x128xf32>
    %41 = vector.shape_cast %40 : vector<1x128x128xf32> to vector<128x128xf32>
    %cst_52 = arith.constant dense<0.000000e+00> : vector<16x128xf32>
    %42 = tpu.matmul %39, %41, %cst_52 {dimension_numbers = #tpu.dot_dimension_numbers<[1], [0], [0], [1], [0, 0, 1, 1], [], []>} : vector<16x128xf32>, vector<128x128xf32>, vector<16x128xf32> -> vector<16x128xf32>
    %43 = arith.addf %38, %42 : vector<16x128xf32>
    %44 = vector.broadcast %29 : vector<1x128xf32> to vector<16x128xf32>
    %45 = arith.addf %43, %44 : vector<16x128xf32>
    %cst_53 = arith.constant 0.000000e+00 : f32
    %46 = vector.broadcast %cst_53 : f32 to vector<16x128xf32>
    %47 = arith.maximumf %45, %46 : vector<16x128xf32>
    %c0_54 = arith.constant 0 : index
    %c0_55 = arith.constant 0 : index
    %c0_56 = arith.constant 0 : index
    %48 = vector.load %arg6[%c0_54, %c0_55, %c0_56] : memref<1x16x128xf32, #tpu.memory_space<vmem>>, vector<1x16x128xf32>
    %49 = vector.shape_cast %48 : vector<1x16x128xf32> to vector<16x128xf32>
    %50 = vector.shape_cast %47 : vector<16x128xf32> to vector<1x16x128xf32>
    tpu.vector_store %arg6[%c0_54, %c0_55, %c0_56], %50 {strides = array<i32>} : memref<1x16x128xf32, #tpu.memory_space<vmem>>, vector<1x16x128xf32>,
    return
  }
  func.func @transform_0(%arg0: i32) -> (i32, i32, i32) {
    %c0_i32 = arith.constant 0 : i32
    %c0_i32_0 = arith.constant 0 : i32
    %c0_i32_1 = arith.constant 0 : i32
    return %arg0, %c0_i32, %c0_i32_0 : i32, i32, i32
  }
  func.func @transform_1(%arg0: i32) -> (i32, i32, i32) {
    %c0_i32 = arith.constant 0 : i32
    %c0_i32_0 = arith.constant 0 : i32
    %c0_i32_1 = arith.constant 0 : i32
    %c0_i32_2 = arith.constant 0 : i32
    return %c0_i32, %c0_i32_0, %c0_i32_1 : i32, i32, i32
  }
  func.func @transform_2(%arg0: i32) -> (i32, i32) {
    %c0_i32 = arith.constant 0 : i32
    %c0_i32_0 = arith.constant 0 : i32
    %c0_i32_1 = arith.constant 0 : i32
    return %c0_i32, %c0_i32_0 : i32, i32
  }
  func.func @transform_3(%arg0: i32) -> (i32, i32, i32) {
    %c0_i32 = arith.constant 0 : i32
    %c0_i32_0 = arith.constant 0 : i32
    %c0_i32_1 = arith.constant 0 : i32
    %c0_i32_2 = arith.constant 0 : i32
    return %c0_i32, %c0_i32_0, %c0_i32_1 : i32, i32, i32
  }
  func.func @transform_4(%arg0: i32) -> (i32, i32) {
    %c0_i32 = arith.constant 0 : i32
    %c0_i32_0 = arith.constant 0 : i32
    %c0_i32_1 = arith.constant 0 : i32
    return %c0_i32, %c0_i32_0 : i32, i32
  }
  func.func @transform_5(%arg0: i32) -> (i32, i32, i32) {
    %c0_i32 = arith.constant 0 : i32
    %c0_i32_0 = arith.constant 0 : i32
    %c0_i32_1 = arith.constant 0 : i32
    return %arg0, %c0_i32, %c0_i32_0 : i32, i32, i32
  }
}

</mosaic_0001>

<bundles_post_ra>
// kernel: tpu_custom_call.1
= control target key start
LH: loop header
LB: loop body
LE: loop exit
PB: predicated region body
PF: predicated region fallthrough
CT: control target
= control target key end

     0   :  { %10 = vsyncpa [#allocation5], 0  ;;  %s1728_s0 = inlined_call_operand.hbm [shape: f32[2,16,64], index: 0, kind: input, shape index: {}]   ;;  %s1729_s1 = inlined_call_operand.hbm [shape: f32[3,64,128], index: 1, kind: input, shape index: {}]   ;;  %s1730_s2 = inlined_call_operand.vmem [shape: f32[1,128], index: 2, kind: input, shape index: {}]   ;;  %s1731_s3 = inlined_call_operand.hbm [shape: f32[3,128,128], index: 3, kind: input, shape index: {}]   ;;  %s1732_s4 = inlined_call_operand.vmem [shape: f32[1,128], index: 4, kind: input, shape index: {}]   ;;  %s1733_s5 = inlined_call_operand.hbm [shape: f32[2,16,128], index: 5, kind: output, shape index: {}]  }
   0x1   :  { %12 = vsyncpa [#allocation5 + $0x1], 0 }
   0x2   :  { %13 = vsyncpa [#allocation8], 0 }
   0x3   :  { %14 = vsyncpa [#allocation6], 0 }
   0x4   :  { %16 = vsyncpa [#allocation6 + $0x1], 0  ;;  %s1509_s18 = smov 0   ;;  %s1511_s19 = smov 0  }
   0x5   :  { %s1513_s20 = smov 0   ;;  %s1515_s21 = smov 0  }
   0x6 LB: > { %s1530_s22 = sadd.s32 4294967295, %s1468_s21   ;;  %s974_s23 = sadd.s32 4294967294, %s1468_s21   ;;  %s1468_s21 = sphi %s1515_s21, %s1756_s21   ;;  %s1464_s20 = sphi %s1513_s20, %s1755_s20   ;;  %s1460_s19 = sphi %s1511_s19, %s1754_s19   ;;  %s1456_s18 = sphi %s1509_s18, %s1753_s18  }
   0x7   : > { %p42_p0 = scmp.ne.s32.totalorder %s1460_s19, %s1456_s18  ;;  %p1734_p1 = scmp.eq.s32.totalorder %s1530_s22, 0 }
   0x8   : > { %p150_p2 = scmp.eq.s32.totalorder %s1530_s22, 1  ;;  %p156_p3 = scmp.eq.s32.totalorder %s974_s23, 1 }
   0x9   : > { %p1539_p4 = por %p1734_p1, %p42_p0  ;;  %p975_p5 = scmp.ge.s32.totalorder %s1468_s21, 1 }
   0xa   : > { %p1544_p6 = por %p156_p3, %p42_p0  ;;  %p163_p7 = scmp.lt.s32.totalorder %s1468_s21, 3 }
   0xb   : > { %s1739_s24 = scalar_select %p1539_p4, 1, 0 }
   0xc   : > { %s1740_s25 = scalar_select %p1544_p6, 1, 0 }
   0xd   : > { %p1549_p8 = pnand %p975_p5, %p163_p7  ;;  %s1470_s27 = smov [#allocation7]  }
   0xe   : > { %s175_s28 = sshll.u32 %s1470_s27, 4  ;;  %s1471_s30 = smov [#allocation9]   ;;  %s176_s28 = int_to_ptr.vmem [resolvable:$true] %s175_s28 }
   0xf   : > { %s1741_s26 = scalar_select %p1549_p8, 1, 0 }
  0x10   : > { %p1260_p9 = pneg %p1549_p8  ;;  %s191_s6 = sshll.u32 %s1471_s30, 4  ;;  %s192_s6 = int_to_ptr.vmem [resolvable:$true] %s191_s6 }
  0x11   : > { %s1331_s7 = scalar_lea.vmem %s176_s28, 3072  ;;  %p1339_p5 = scmp.lt.s32.totalorder %s176_s28, %s176_s28 }
  0x12   : > { %p1558_p11 = pnand %p1260_p9, %p1734_p1  ;;  %p1332_p13 = scmp.ne.s32.totalorder %s176_s28, %s1331_s7 }
  0x13   : > { %p1340_p7 = scmp.lt.s32.totalorder %s1331_s7, %s1331_s7 }
  0x14   : > { %p1322_p12 = pneg %p1558_p11 }
  0x15   : > { %p1341_p10 = por %p1340_p7, %p1339_p5 }
  0x16   : > { %p1334_p0 = pnand %p1332_p13, %p1322_p12 }
  0x18   : > { %p1335_p3 = pneg %p1334_p0 }
  0x1a   : > { %p1342_p9 = pnand %p1341_p10, %p1335_p3 }
  0x1c   : > { %1345 = shalt.err (!%p1342_p9)
}
  0x1d   : > { %s1735_s8 = smov 128   ;;  %s1473_s9 = smov 8  }
  0x1e   : > { %1263 = dma.hbm_to_vmem [thread:$0]  (!%p1558_p11), %s1729_s1, 3072, %s176_s28, [#allocation8], %s1735_s8, %s1735_s8, %s1473_s9  }
  0x1f   : > { %s1357_s12 = scalar_lea.vmem %s192_s6, 6144  ;;  %p1365_p10 = scmp.lt.s32.totalorder %s192_s6, %s192_s6 }
  0x20   : > { %p1358_p13 = scmp.ne.s32.totalorder %s192_s6, %s1357_s12  ;;  %p1366_p3 = scmp.lt.s32.totalorder %s1357_s12, %s1357_s12 }
  0x22   : > { %p1360_p0 = pnand %p1358_p13, %p1322_p12  ;;  %p1367_p7 = por %p1366_p3, %p1365_p10 }
  0x24   : > { %p1361_p5 = pneg %p1360_p0 }
  0x26   : > { %p1368_p9 = pnand %p1367_p7, %p1361_p5 }
  0x28   : > { %1371 = shalt.err (!%p1368_p9)
}
  0x29   : > { %1266 = dma.hbm_to_vmem [thread:$0]  (!%p1558_p11), %s1731_s3, 6144, %s192_s6, [#allocation8], %s1735_s8, %s1735_s8, %s1473_s9  }
  0x2a   : > { %s1587_s15 = sadd.s32 1, %s1468_s21   ;;  %s29_s16 = sadd.s32 1, %s1464_s20 }
  0x2b   : > { %s26_s17 = ssub.s32 %s1468_s21, %s1587_s15  ;;  %p36_p12 = scmp.ne.s32.totalorder %s1464_s20, %s1460_s19 }
  0x2c   : > { %p27_p13 = scmp.eq.s32.totalorder %s26_s17, 0  ;;  %p37_p0 = scmp.eq.s32.totalorder %s1468_s21, 0 }
  0x2d   : > { %p1597_p5 = por %p150_p2, %p36_p12  ;;  %p1277_p10 = scmp.lt.s32.totalorder %s1468_s21, 2 }
  0x2e   : > { %s1603_s27 = scalar_select %p27_p13, %s1464_s20, %s29_s16  }
  0x2f   : > { %s1743_s23 = scalar_select %p1597_p5, 1, 0 }
  0x30   : > { %p38_p3 = por %p37_p0, %p36_p12  ;;  %s208_s28 = sand.u32 1, %s1464_s20  }
  0x31   : > { %s979_s29 = sshll.u32 %s208_s28, 4  ;;  %s1000_s30 = sshll.u32 %s1468_s21, 8 }
  0x32   : > { %s1610_s10 = scalar_lea.hbm %s1728_s0, %s1000_s30  ;;  %s212_s11 = scalar_lea.vmem [#allocation4], %s979_s29 }
  0x33   : > { %s219_s12 = sshll.u32 %s212_s11, 4  ;;  %p1614_p2 = pnand %p1277_p10, %p38_p3  ;;  %s1612_s12 = int_to_ptr.vmem [resolvable:$true] %s219_s12 }
  0x34   : > { %s1618_s14 = scalar_lea.sflag [#allocation5], %s208_s28  ;;  %s1372_s16 = scalar_lea.hbm %s1610_s10, 256 }
  0x35   : > { %p1373_p11 = scmp.ne.s32.totalorder %s1610_s10, %s1372_s16  ;;  %p1374_p7 = pneg %p1614_p2 }
  0x36   : > { %s1377_s29 = scalar_lea.hbm %s1728_s0, 512  ;;  %p1378_p13 = scmp.lt.s32.totalorder %s1610_s10, %s1728_s0 }
  0x37   : > { %p1375_p9 = pnand %p1374_p7, %p1373_p11  ;;  %p1379_p0 = scmp.lt.s32.totalorder %s1377_s29, %s1372_s16 }
  0x39   : > { %p1376_p12 = pneg %p1375_p9  ;;  %p1380_p10 = por %p1379_p0, %p1378_p13 }
  0x3b   : > { %p1381_p3 = pnand %p1380_p10, %p1376_p12 }
  0x3d   : > { %1384 = shalt.err (!%p1381_p3)
}
  0x3e   : > { %s1385_s28 = scalar_lea.vmem %s1612_s12, 256  ;;  %s1474_s11 = smov [#allocation4]  }
  0x3f   : > { %p1386_p1 = scmp.ne.s32.totalorder %s1612_s12, %s1385_s28  ;;  %s1390_s8 = sshll.u32 %s1474_s11, 4  ;;  %s1391_s8 = int_to_ptr.vmem [resolvable:$false] %s1390_s8 }
  0x40   : > { %s1392_s17 = scalar_lea.vmem %s1391_s8, 512  ;;  %p1393_p9 = scmp.lt.s32.totalorder %s1612_s12, %s1391_s8 }
  0x41   : > { %p1388_p6 = pnand %p1386_p1, %p1374_p7  ;;  %p1394_p5 = scmp.lt.s32.totalorder %s1392_s17, %s1385_s28 }
  0x43   : > { %p1389_p11 = pneg %p1388_p6  ;;  %p1395_p4 = por %p1394_p5, %p1393_p9 }
  0x45   : > { %p1396_p8 = pnand %p1395_p4, %p1389_p11 }
  0x47   : > { %1399 = shalt.err (!%p1396_p8)
}
  0x48   : > { %s1745_s16 = smov 128   ;;  %p1746_p1 = scmp.ne.s32.totalorder %s1741_s26, 0 }
  0x49   : > { %1270 = dma.hbm_to_vmem [thread:$0]  (!%p1614_p2), %s1610_s10, 256, %s1612_s12, %s1618_s14, %s1745_s16, %s1745_s16, %s1473_s9  }
  0x4a   : > { %231 = sbr.rel (%p1746_p1) target bundleno = 568 (0x238), region = 40  ;;  %s1645_s30 = sand.u32 (!%p1746_p1), 1, %s1460_s19  }
  0x4b   : > { %s983_s8 = sshll.u32 (!%p1746_p1), %s1645_s30, 4  ;;  %s234_s29 = scalar_lea.sflag (!%p1746_p1), [#allocation5], %s1645_s30 }
  0x4c   : > { %s1651_s13 = scalar_lea.vmem (!%p1746_p1), [#allocation4], %s983_s8  ;;  %p1747_p4 = scmp.ne.s32.totalorder (!%p1746_p1), %s1739_s24, 0 }
  0x4f   : > { %1443 = dma.done.wait (%p1747_p4), %s234_s29, 256  }
  0x50   : > { %1445 = vsyncadd (%p1747_p4), %s234_s29, 4294967040  ;;  %p1748_p6 = scmp.eq.s32.totalorder %s1530_s22, 0 }
  0x52   : > { %1447 = dma.done.wait (%p1748_p6), [#allocation8], 9216   ;;  %p1749_p8 = pmov %p1748_p6 }
  0x53   : > { %vm272_vm0 = vcmask 516096   ;;  %v1475_v0 = vmov 0.0   ;;  %v301_v1 = vld [vmem:[#allocation7 + $0x78] sm:$0xff]  ;;  %v300_v3 = vld [vmem:[#allocation7 + $0x70] sm:$0xff]  ;;  %v299_v5 = vld [vmem:[#allocation7 + $0x68] sm:$0xff]  ;;  %vm277_vm1 = vcmask 523264  }
  0x54   : > { %1449 = vsyncadd (%p1749_p8), [#allocation8], 4294958080  ;;  %273 = vst.msk [vmem:[#allocation2] sm:$0x1] %vm272_vm0, %v1475_v0  ;;  %v290_v2 = vld [vmem:[#allocation7 + $0x38] sm:$0xff]  ;;  %1086 = vmatprep.subr.mxu0 %v301_v1  ;;  %v289_v4 = vld [vmem:[#allocation7 + $0x30] sm:$0xff] }
  0x55   : > { %274 = vst.msk [vmem:[#allocation2 + $0x11] sm:$0x1] %vm272_vm0, %v1475_v0  ;;  %568 = vst [vmem:[#allocation3] sm:$0x1] %v1475_v0  ;;  %1105 = vmatprep.subr.mxu1 %v290_v2  ;;  %1087 = vmatpush3.msra.mxu0 %v301_v1  ;;  %v288_v6 = vld [vmem:[#allocation7 + $0x28] sm:$0xff]  ;;  %v298_v7 = vld [vmem:[#allocation7 + $0x60] sm:$0xff] }
  0x56   : > { %569 = vst [vmem:[#allocation3 + $0x11] sm:$0x1] %v1475_v0  ;;  %1106 = vmatpush3.msra.mxu1 %v290_v2  ;;  %1088 = vmatprep.subr.mxu0 %v300_v3  ;;  %v287_v8 = vld [vmem:[#allocation7 + $0x20] sm:$0xff]  ;;  %v276_v10 = vld [vmem:[%s1651_s13 + $0x8] sm:$0xff]  ;;  %v296_v13 = vld [vmem:[#allocation7 + $0x50] sm:$0xff]  ;;  %s271_s12 = scalar_lea.vmem [#allocation10], %s983_s8 }
  0x57   : > { %1107 = vmatprep.subr.mxu1 %v289_v4  ;;  %1089 = vmatpush3.msra.mxu0 %v300_v3  ;;  %v275_v9 = vld [vmem:[%s1651_s13] sm:$0xff]  ;;  %v297_v11 = vld [vmem:[#allocation7 + $0x58] sm:$0xff]  ;;  %279 = vst.msk [vmem:[#allocation2 + $0x9] sm:$0xff] %vm277_vm1, %v276_v10  ;;  %v295_v15 = vld [vmem:[#allocation7 + $0x48] sm:$0xff]  ;;  %s882_s14 = sshll.u32 %s271_s12, 4  ;;  %s1001_s6 = sshll.u32 %s1530_s22, 8  ;;  %s1680_s14 = int_to_ptr.vmem [resolvable:$true] %s882_s14 }
  0x58   : > { %1108 = vmatpush3.msra.mxu1 %v289_v4  ;;  %1090 = vmatprep.subr.mxu0 %v299_v5  ;;  %v286_v12 = vld [vmem:[#allocation7 + $0x18] sm:$0xff]  ;;  %278 = vst.msk [vmem:[#allocation2 + $0x1] sm:$0xff] %vm277_vm1, %v275_v9  ;;  %v285_v14 = vld [vmem:[#allocation7 + $0x10] sm:$0xff]  ;;  %v284_v16 = vld [vmem:[#allocation7 + $0x8] sm:$0xff]  ;;  %s1685_s11 = scalar_lea.hbm %s1733_s5, %s1001_s6  ;;  %s869_s17 = scalar_lea.sflag [#allocation6], %s1645_s30 }
  0x59   : > { %1109 = vmatprep.subr.mxu1 %v288_v6  ;;  %1091 = vmatpush3.msra.mxu0 %v299_v5  ;;  %v294_v17 = vld [vmem:[#allocation7 + $0x40] sm:$0xff]  ;;  %v474_v23 = vld [vmem:[#allocation7 + $0xb8] sm:$0xff]  ;;  %v473_v25 = vld [vmem:[#allocation7 + $0xb0] sm:$0xff]  ;;  %s1400_s16 = scalar_lea.vmem %s1680_s14, 256  ;;  %p1750_p2 = scmp.ne.s32.totalorder %s1743_s23, 0 }
  0x5a   : > { %1110 = vmatpush3.msra.mxu1 %v288_v6  ;;  %1092 = vmatprep.subr.mxu0 %v298_v7  ;;  %v283_v18 = vld [vmem:[#allocation7] sm:$0xff]  ;;  %v472_v26 = vld [vmem:[#allocation7 + $0xa8] sm:$0xff]  ;;  %v470_v28 = vld [vmem:[#allocation7 + $0x98] sm:$0xff]  ;;  %p1401_p5 = scmp.ne.s32.totalorder %s1680_s14, %s1400_s16  ;;  %s1476_s22 = smov [#allocation10]  }
  0x5b   : > { %1111 = vmatprep.subr.mxu1 %v287_v8  ;;  %1093 = vmatpush3.msra.mxu0 %v298_v7  ;;  %v471_v27 = vld [vmem:[#allocation7 + $0xa0] sm:$0xff]  ;;  %v469_v29 = vld [vmem:[#allocation7 + $0x90] sm:$0xff]  ;;  %v468_v30 = vld [vmem:[#allocation7 + $0x88] sm:$0xff]  ;;  %s1404_s8 = sshll.u32 %s1476_s22, 4  ;;  %s1405_s8 = int_to_ptr.vmem [resolvable:$false] %s1404_s8 }
  0x5c   : > { %1112 = vmatpush3.msra.mxu1 %v287_v8  ;;  %1094 = vmatprep.subr.mxu0 %v297_v11  ;;  %v467_v31 = vld [vmem:[#allocation7 + $0x80] sm:$0xff]  ;;  %v609_v33 = vld [vmem:[#allocation9 + $0xf8] sm:$0xff]  ;;  %v608_v34 = vld [vmem:[#allocation9 + $0xf0] sm:$0xff]  ;;  %p1402_p7 = pnand %p1401_p5, %p1750_p2  ;;  %s1406_s29 = scalar_lea.vmem %s1405_s8, 512 }
  0x5d   : > { %1113 = vmatprep.subr.mxu1 %v286_v12  ;;  %1095 = vmatpush3.msra.mxu0 %v297_v11  ;;  %v607_v35 = vld [vmem:[#allocation9 + $0xe8] sm:$0xff]  ;;  %v606_v36 = vld [vmem:[#allocation9 + $0xe0] sm:$0xff]  ;;  %v605_v37 = vld [vmem:[#allocation9 + $0xd8] sm:$0xff]  ;;  %p1407_p13 = scmp.lt.s32.totalorder %s1680_s14, %s1405_s8  ;;  %p1408_p0 = scmp.lt.s32.totalorder %s1406_s29, %s1400_s16 }
  0x5e   : > { %1114 = vmatpush3.msra.mxu1 %v286_v12  ;;  %1096 = vmatprep.subr.mxu0 %v296_v13  ;;  %v292_v21 = vld [vmem:[#allocation2 + $0x9] sm:$0xff]  ;;  %v589_v39 = vld [vmem:[#allocation9 + $0x70] sm:$0xff]  ;;  %v588_v40 = vld [vmem:[#allocation9 + $0x68] sm:$0xff]  ;;  %p1403_p12 = pneg %p1402_p7 }
  0x5f   : > { %1115 = vmatprep.subr.mxu1 %v285_v14  ;;  %1097 = vmatpush3.msra.mxu0 %v296_v13  ;;  %v291_v19 = vld [vmem:[#allocation2 + $0x1] sm:$0xff]  ;;  %v465_v32 = vld [vmem:[#allocation2 + $0xa] sm:$0xff]  ;;  %v603_v42 = vld [vmem:[#allocation9 + $0xc8] sm:$0xff]  ;;  %p1409_p10 = por %p1408_p0, %p1407_p13 }
  0x60   : > { %1116 = vmatpush3.msra.mxu1 %v285_v14  ;;  %1098 = vmatprep.subr.mxu0 %v295_v15  ;;  %v281_v20 = vld [vmem:[#allocation2] sm:$0xff]  ;;  %v282_v22 = vld [vmem:[#allocation2 + $0x8] sm:$0xff]  ;;  %v587_v43 = vld [vmem:[#allocation9 + $0x60] sm:$0xff] }
  0x61   : > { %1117 = vmatprep.subr.mxu1 %v284_v16  ;;  %1099 = vmatpush3.msra.mxu0 %v295_v15  ;;  %v464_v24 = vld [vmem:[#allocation2 + $0x2] sm:$0xff]  ;;  %v602_v44 = vld [vmem:[#allocation9 + $0xc0] sm:$0xff]  ;;  %v584_v49 = vld [vmem:[#allocation9 + $0x48] sm:$0xff]  ;;  %p1410_p3 = pnand %p1409_p10, %p1403_p12 }
  0x62   : > { %1118 = vmatpush3.msra.mxu1 %v284_v16  ;;  %1100 = vmatprep.subr.mxu0 %v294_v17  ;;  %v590_v38 = vld [vmem:[#allocation9 + $0x78] sm:$0xff]  ;;  %v604_v41 = vld [vmem:[#allocation9 + $0xd0] sm:$0xff]  ;;  %v599_v50 = vld [vmem:[#allocation9 + $0xa8] sm:$0xff] }
  0x63   : > { %1119 = vmatprep.subr.mxu1 %v283_v18  ;;  %1101 = vmatpush3.msra.mxu0 %v294_v17  ;;  %v586_v45 = vld [vmem:[#allocation9 + $0x58] sm:$0xff]  ;;  %v585_v47 = vld [vmem:[#allocation9 + $0x50] sm:$0xff]  ;;  %v598_v51 = vld [vmem:[#allocation9 + $0xa0] sm:$0xff] }
  0x64   : > { %1102 = vmatprep.mubr.msk.f32.mxu0 %vm277_vm1, %v291_v19  ;;  %1120 = vmatpush3.msra.mxu1 %v283_v18  ;;  %v601_v46 = vld [vmem:[#allocation9 + $0xb8] sm:$0xff]  ;;  %v600_v48 = vld [vmem:[#allocation9 + $0xb0] sm:$0xff]  ;;  %v583_v52 = vld [vmem:[#allocation9 + $0x40] sm:$0xff] }
  0x65   : > { %1121 = vmatprep.mubr.msk.f32.mxu1 %vm277_vm1, %v281_v20  ;;  %1103 = vmatmul.mubr.msk.f32.vlgmr.msra.gmra.mxu0 %vm277_vm1, %v292_v21  ;;  %v597_v53 = vld [vmem:[#allocation9 + $0x98] sm:$0xff]  ;;  %v596_v55 = vld [vmem:[#allocation9 + $0x90] sm:$0xff]  ;;  %v595_v57 = vld [vmem:[#allocation9 + $0x88] sm:$0xff] }
  0x66   : > { %1122 = vmatmul.mubr.msk.f32.vlgmr.msra.gmra.mxu1 %vm277_vm1, %v282_v22  ;;  %1124 = vmatprep.subr.mxu0 %v474_v23  ;;  %v582_v54 = vld [vmem:[#allocation9 + $0x38] sm:$0xff]  ;;  %v581_v56 = vld [vmem:[#allocation9 + $0x30] sm:$0xff]  ;;  %v580_v58 = vld [vmem:[#allocation9 + $0x28] sm:$0xff] }
  0x67   : > { %1140 = vmatprep.mubr.msk.f32.mxu0 %vm277_vm1, %v464_v24  ;;  %1125 = vmatpush3.msra.mxu0 %v474_v23  ;;  %v594_v59 = vld [vmem:[#allocation9 + $0x80] sm:$0xff]  ;;  %v778_v61 = vld [vmem:[#allocation9 + $0x178] sm:$0xff]  ;;  %v577_v63 = vld [vmem:[#allocation9 + $0x10] sm:$0xff] }
  0x68   : > { %1126 = vmatprep.subr.mxu0 %v473_v25  ;;  %1143 = vmatprep.subr.mxu1 %v609_v33  ;;  %v579_v60 = vld [vmem:[#allocation9 + $0x20] sm:$0xff]  ;;  %v578_v62 = vld [vmem:[#allocation9 + $0x18] sm:$0xff]  ;;  %v576_v0 = vld [vmem:[#allocation9 + $0x8] sm:$0xff] }
  0x69   : > { %1127 = vmatpush3.msra.mxu0 %v473_v25  ;;  %1144 = vmatpush3.msra.mxu1 %v609_v33  ;;  %v575_v1 = vld [vmem:[#allocation9] sm:$0xff]  ;;  %v993_v7 = vld [vmem:[%s1730_s2] ss:$0 sm:$0xff]  ;;  %v776_v18 = vld [vmem:[#allocation9 + $0x168] sm:$0xff] }
  0x6a   : > { %1128 = vmatprep.subr.mxu0 %v472_v26  ;;  %1145 = vmatprep.subr.mxu1 %v608_v34  ;;  %v777_v17 = vld [vmem:[#allocation9 + $0x170] sm:$0xff]  ;;  %v775_v19 = vld [vmem:[#allocation9 + $0x160] sm:$0xff]  ;;  %v774_v20 = vld [vmem:[#allocation9 + $0x158] sm:$0xff] }
  0x6b   : > { %1129 = vmatpush3.msra.mxu0 %v472_v26  ;;  %1146 = vmatpush3.msra.mxu1 %v608_v34  ;;  %v773_v24 = vld [vmem:[#allocation9 + $0x150] sm:$0xff]  ;;  %v772_v25 = vld [vmem:[#allocation9 + $0x148] sm:$0xff]  ;;  %v771_v26 = vld [vmem:[#allocation9 + $0x140] sm:$0xff] }
  0x6c   : > { %1130 = vmatprep.subr.mxu0 %v471_v27  ;;  %1147 = vmatprep.subr.mxu1 %v607_v35  ;;  %v764_v33 = vld [vmem:[#allocation9 + $0x108] sm:$0xff]  ;;  %v763_v34 = vld [vmem:[#allocation9 + $0x100] sm:$0xff] }
  0x6d   : > { %1131 = vmatpush3.msra.mxu0 %v471_v27  ;;  %1148 = vmatpush3.msra.mxu1 %v607_v35  ;;  %v770_v27 = vld [vmem:[#allocation9 + $0x138] sm:$0xff] }
  0x6e   : > { %1132 = vmatprep.subr.mxu0 %v470_v28  ;;  %1149 = vmatprep.subr.mxu1 %v606_v36 }
  0x6f   : > { %1133 = vmatpush3.msra.mxu0 %v470_v28  ;;  %1150 = vmatpush3.msra.mxu1 %v606_v36  ;;  %v769_v28 = vld [vmem:[#allocation9 + $0x130] sm:$0xff] }
  0x70   : > { %1134 = vmatprep.subr.mxu0 %v469_v29  ;;  %1151 = vmatprep.subr.mxu1 %v605_v37 }
  0x71   : > { %1135 = vmatpush3.msra.mxu0 %v469_v29  ;;  %1152 = vmatpush3.msra.mxu1 %v605_v37  ;;  %v768_v29 = vld [vmem:[#allocation9 + $0x128] sm:$0xff] }
  0x72   : > { %1136 = vmatprep.subr.mxu0 %v468_v30  ;;  %1153 = vmatprep.subr.mxu1 %v604_v41 }
  0x73   : > { %1137 = vmatpush3.msra.mxu0 %v468_v30  ;;  %1154 = vmatpush3.msra.mxu1 %v604_v41  ;;  %v767_v30 = vld [vmem:[#allocation9 + $0x120] sm:$0xff]  ;;  %v994_v41 = vld [vmem:[%s1732_s4] ss:$0 sm:$0xff] }
  0x74   : > { %1138 = vmatprep.subr.mxu0 %v467_v31  ;;  %1155 = vmatprep.subr.mxu1 %v603_v42 }
  0x75   : > { %1139 = vmatpush3.msra.mxu0 %v467_v31  ;;  %1156 = vmatpush3.msra.mxu1 %v603_v42  ;;  %v766_v31 = vld [vmem:[#allocation9 + $0x118] sm:$0xff] }
  0x76   : > { %1141 = vmatmul.mubr.msk.f32.vlgmr.msra.gmra.mxu0 %vm277_vm1, %v465_v32  ;;  %1178 = vmatprep.subr.mxu0 %v590_v38  ;;  %v765_v32 = vld [vmem:[#allocation9 + $0x110] sm:$0xff] }
  0x77   : > { %1179 = vmatpush3.msra.mxu0 %v590_v38  ;;  %1157 = vmatprep.subr.mxu1 %v602_v44 }
  0x78   : > { %1180 = vmatprep.subr.mxu0 %v589_v39  ;;  %1158 = vmatpush3.msra.mxu1 %v602_v44 }
  0x79   : > { %1181 = vmatpush3.msra.mxu0 %v589_v39  ;;  %1159 = vmatprep.subr.mxu1 %v601_v46 }
  0x7a   : > { %1182 = vmatprep.subr.mxu0 %v588_v40  ;;  %1160 = vmatpush3.msra.mxu1 %v601_v46 }
  0x7b   : > { %1183 = vmatpush3.msra.mxu0 %v588_v40  ;;  %1161 = vmatprep.subr.mxu1 %v600_v48 }
  0x7c   : > { %1184 = vmatprep.subr.mxu0 %v587_v43  ;;  %1162 = vmatpush3.msra.mxu1 %v600_v48 }
  0x7d   : > { %1185 = vmatpush3.msra.mxu0 %v587_v43  ;;  %1163 = vmatprep.subr.mxu1 %v599_v50 }
  0x7e   : > { %1186 = vmatprep.subr.mxu0 %v586_v45  ;;  %1164 = vmatpush3.msra.mxu1 %v599_v50 }
  0x7f   : > { %1187 = vmatpush3.msra.mxu0 %v586_v45  ;;  %1165 = vmatprep.subr.mxu1 %v598_v51 }
  0x80   : > { %1188 = vmatprep.subr.mxu0 %v585_v47  ;;  %1166 = vmatpush3.msra.mxu1 %v598_v51 }
  0x81   : > { %1189 = vmatpush3.msra.mxu0 %v585_v47  ;;  %1167 = vmatprep.subr.mxu1 %v597_v53 }
  0x82   : > { %1190 = vmatprep.subr.mxu0 %v584_v49  ;;  %1168 = vmatpush3.msra.mxu1 %v597_v53 }
  0x83   : > { %1191 = vmatpush3.msra.mxu0 %v584_v49  ;;  %1169 = vmatprep.subr.mxu1 %v596_v55 }
  0x84   : > { %1192 = vmatprep.subr.mxu0 %v583_v52  ;;  %1170 = vmatpush3.msra.mxu1 %v596_v55 }
  0x85   : > { %1193 = vmatpush3.msra.mxu0 %v583_v52  ;;  %1171 = vmatprep.subr.mxu1 %v595_v57 }
  0x86   : > { %1194 = vmatprep.subr.mxu0 %v582_v54  ;;  %1172 = vmatpush3.msra.mxu1 %v595_v57 }
  0x87   : > { %1195 = vmatpush3.msra.mxu0 %v582_v54  ;;  %1173 = vmatprep.subr.mxu1 %v594_v59 }
  0x88   : > { %1196 = vmatprep.subr.mxu0 %v581_v56  ;;  %1174 = vmatpush3.msra.mxu1 %v594_v59 }
  0x89   : > { %1197 = vmatpush3.msra.mxu0 %v581_v56  ;;  %1213 = vmatprep.subr.mxu1 %v778_v61 }
  0x8a   : > { %1198 = vmatprep.subr.mxu0 %v580_v58 }
  0x8b   : > { %1199 = vmatpush3.msra.mxu0 %v580_v58 }
  0x8c   : > { %1200 = vmatprep.subr.mxu0 %v579_v60 }
  0x8d   : > { %1201 = vmatpush3.msra.mxu0 %v579_v60 }
  0x8e   : > { %1202 = vmatprep.subr.mxu0 %v578_v62 }
  0x8f   : > { %1203 = vmatpush3.msra.mxu0 %v578_v62 }
  0x90   : > { %1204 = vmatprep.subr.mxu0 %v577_v63 }
  0x91   : > { %1205 = vmatpush3.msra.mxu0 %v577_v63 }
  0x92   : > { %1206 = vmatprep.subr.mxu0 %v576_v0 }
  0x93   : > { %1207 = vmatpush3.msra.mxu0 %v576_v0 }
  0x94   : > { %1208 = vmatprep.subr.mxu0 %v575_v1 }
  0x95   : > { %1209 = vmatpush3.msra.mxu0 %v575_v1 }
 0x125   : > { %v1104_v2 = vpop.f32.mrf.mxu0 }
 0x126   : > { %v1123_v3 = vpop.f32.mrf.mxu1 }
 0x127   : > { %v374_v4 = vpop.f32.mrf.mxu0  ;;  %v461_v6 = vadd.f32 %v1123_v3, %v1104_v2 }
 0x128   : > { %v455_v5 = vpop.f32.mrf.mxu1 }
 0x129   : > { %v456_v9 = vadd.f32 %v455_v5, %v374_v4 }
 0x136   : > { %v1142_v8 = vpop.f32.mrf.mxu0 }
 0x137   : > { %v557_v10 = vadd.f32 %v1142_v8, %v461_v6 }
 0x138   : > { %v547_v11 = vpop.f32.mrf.mxu0 }
 0x139   : > { %v565_v12 = vadd.f32 %v993_v7, %v557_v10  ;;  %v556_v13 = vadd.f32 %v547_v11, %v456_v9 }
 0x13b   : > { %v567_v14 = vmax.f32 %v565_v12, 0.0  ;;  %v564_v15 = vadd.f32 %v993_v7, %v556_v13 }
 0x13d   : > { %571 = vst [vmem:[#allocation3 + $0x9] sm:$0xff] %v567_v14  ;;  %v566_v16 = vmax.f32 %v564_v15, 0.0 }
 0x13f   : > { %570 = vst [vmem:[#allocation3 + $0x1] sm:$0xff] %v566_v16  ;;  %1175 = vmatprep.mubr.f32.mxu1 %v566_v16 }
 0x140   : > { %1176 = vmatmul.mubr.f32.vlgmr.msra.gmra.mxu1 %v567_v14 }
 0x141   : > { %1214 = vmatpush3.msra.mxu1 %v778_v61 }
 0x142   : > { %1215 = vmatprep.subr.mxu1 %v777_v17 }
 0x143   : > { %1216 = vmatpush3.msra.mxu1 %v777_v17 }
 0x144   : > { %1217 = vmatprep.subr.mxu1 %v776_v18  ;;  %v761_v35 = vld [vmem:[#allocation3 + $0xa] sm:$0xff] }
 0x145   : > { %1218 = vmatpush3.msra.mxu1 %v776_v18 }
 0x146   : > { %v573_v21 = vld [vmem:[#allocation3] sm:$0xff]  ;;  %v574_v22 = vld [vmem:[#allocation3 + $0x8] sm:$0xff]  ;;  %1219 = vmatprep.subr.mxu1 %v775_v19 }
 0x147   : > { %v760_v23 = vld [vmem:[#allocation3 + $0x2] sm:$0xff]  ;;  %1210 = vmatprep.mubr.f32.mxu0 %v573_v21  ;;  %1220 = vmatpush3.msra.mxu1 %v775_v19 }
 0x148   : > { %1245 = vmatprep.mubr.f32.mxu1 %v760_v23  ;;  %1211 = vmatmul.mubr.f32.vlgmr.msra.gmra.mxu0 %v574_v22 }
 0x149   : > { %1221 = vmatprep.subr.mxu1 %v774_v20 }
 0x14a   : > { %1222 = vmatpush3.msra.mxu1 %v774_v20 }
 0x14b   : > { %1223 = vmatprep.subr.mxu1 %v773_v24 }
 0x14c   : > { %1224 = vmatpush3.msra.mxu1 %v773_v24 }
 0x14d   : > { %1225 = vmatprep.subr.mxu1 %v772_v25 }
 0x14e   : > { %1226 = vmatpush3.msra.mxu1 %v772_v25 }
 0x14f   : > { %1227 = vmatprep.subr.mxu1 %v771_v26 }
 0x150   : > { %1228 = vmatpush3.msra.mxu1 %v771_v26 }
 0x151   : > { %1229 = vmatprep.subr.mxu1 %v770_v27 }
 0x152   : > { %1230 = vmatpush3.msra.mxu1 %v770_v27 }
 0x153   : > { %1231 = vmatprep.subr.mxu1 %v769_v28 }
 0x154   : > { %1232 = vmatpush3.msra.mxu1 %v769_v28 }
 0x155   : > { %1233 = vmatprep.subr.mxu1 %v768_v29 }
 0x156   : > { %1234 = vmatpush3.msra.mxu1 %v768_v29 }
 0x157   : > { %1235 = vmatprep.subr.mxu1 %v767_v30 }
 0x158   : > { %1236 = vmatpush3.msra.mxu1 %v767_v30 }
 0x159   : > { %1237 = vmatprep.subr.mxu1 %v766_v31 }
 0x15a   : > { %1238 = vmatpush3.msra.mxu1 %v766_v31 }
 0x15b   : > { %1239 = vmatprep.subr.mxu1 %v765_v32 }
 0x15c   : > { %1240 = vmatpush3.msra.mxu1 %v765_v32 }
 0x15d   : > { %1241 = vmatprep.subr.mxu1 %v764_v33 }
 0x15e   : > { %1242 = vmatpush3.msra.mxu1 %v764_v33 }
 0x15f   : > { %1243 = vmatprep.subr.mxu1 %v763_v34 }
 0x160   : > { %1244 = vmatpush3.msra.mxu1 %v763_v34 }
 0x161   : > { %1246 = vmatmul.mubr.f32.vlgmr.msra.gmra.mxu1 %v761_v35 }
 0x200   : > { %v1177_v36 = vpop.f32.mrf.mxu1 }
 0x202   : > { %v676_v38 = vpop.f32.mrf.mxu1 }
 0x208   : > { %v1212_v37 = vpop.f32.mrf.mxu0 }
 0x209   : > { %v757_v40 = vadd.f32 %v1212_v37, %v1177_v36 }
 0x20a   : > { %v751_v39 = vpop.f32.mrf.mxu0 }
 0x20b   : > { %v752_v43 = vadd.f32 %v751_v39, %v676_v38 }
 0x221   : > { %v1247_v42 = vpop.f32.mrf.mxu1 }
 0x222   : > { %v855_v44 = vadd.f32 %v1247_v42, %v757_v40 }
 0x223   : > { %v845_v45 = vpop.f32.mrf.mxu1 }
 0x224   : > { %v863_v46 = vadd.f32 %v994_v41, %v855_v44  ;;  %v854_v47 = vadd.f32 %v845_v45, %v752_v43 }
 0x226   : > { %v865_v48 = vmax.f32 %v863_v46, 0.0  ;;  %v862_v49 = vadd.f32 %v994_v41, %v854_v47 }
 0x228   : > { %867 = vst [vmem:[%s271_s12 + $0x8] sm:$0xff] %v865_v48  ;;  %v864_v50 = vmax.f32 %v862_v49, 0.0 }
 0x22a   : > { %866 = vst [vmem:[%s271_s12] sm:$0xff] %v864_v50 }
 0x22b   : > { %1413 = shalt.err (!%p1410_p3)
}
 0x22c   : > { %s1414_s13 = scalar_lea.hbm %s1685_s11, 256  ;;  %s1418_s9 = scalar_lea.hbm %s1733_s5, 512 }
 0x22d   : > { %p1415_p11 = scmp.ne.s32.totalorder %s1685_s11, %s1414_s13  ;;  %p1419_p4 = scmp.lt.s32.totalorder %s1685_s11, %s1733_s5 }
 0x22e   : > { %p1420_p6 = scmp.lt.s32.totalorder %s1418_s9, %s1414_s13 }
 0x22f   : > { %p1416_p9 = pnand %p1415_p11, %p1750_p2 }
 0x230   : > { %p1421_p8 = por %p1420_p6, %p1419_p4 }
 0x231   : > { %p1417_p1 = pneg %p1416_p9 }
 0x233   : > { %p1422_p5 = pnand %p1421_p8, %p1417_p1 }
 0x235   : > { %1425 = shalt.err (!%p1422_p5)
}
 0x236   : > { %s1477_s6 = smov 128   ;;  %s1478_s7 = smov 8  }
 0x237   : > { %1258 = dma.vmem_to_hbm [thread:$0]  (%p1750_p2), %s1680_s14, 256, %s1685_s11, %s869_s17, %s1477_s6, %s1477_s6, %s1478_s7  }
 0x238 PF: > { %s897_s28 = sand.u32 1, %s1456_s18   ;;  %p1751_p7 = scmp.ne.s32.totalorder %s1740_s25, 0 }
 0x239   : > { %p1752_p12 = scmp.ge.s32.totalorder %s1468_s21, 2  ;;  %s898_s16 = scalar_lea.sflag [#allocation6], %s897_s28 }
 0x23b   : > { %p1272_p13 = pnand %p1752_p12, %p1751_p7 }
 0x23d   : > { %p1273_p0 = pneg %p1272_p13 }
 0x23f   : > { %1451 = dma.done.wait (%p1273_p0), %s898_s16, 256  }
 0x240   : > { %1453 = vsyncadd (%p1273_p0), %s898_s16, 4294967040  ;;  %p19_p10 = scmp.ge.s32.totalorder %s1587_s15, 4   ;;  %s1753_s18 = smov %s1460_s19 }
 0x241   : > { %s1754_s19 = smov %s1464_s20  ;;  %s1755_s20 = smov %s1603_s27 }
 0x242   : > { %s1756_s21 = smov %s1587_s15  ;;  %21 = sbr.rel (!%p19_p10) target bundleno = 6 (0x6), region = 97 }
 0x247   :  { %903 = vsyncpa [#allocation5], 1 }
 0x248   :  { %905 = vsyncpa [#allocation5 + $0x1], 1 }
 0x249   :  { %906 = vsyncpa [#allocation8], 1 }
 0x24a   :  { %907 = vsyncpa [#allocation6], 1 }
 0x24b   :  { %909 = vsyncpa [#allocation6 + $0x1], 1 }

</bundles_post_ra>
